<compile_context>
chip_gen: v5e
topology: v5e:2x2
jax: 0.10.0
libtpu: 0.0.40
codegen_flags: <defaults>
</compile_context>

<pallas_src>
import functools

import jax
import jax.numpy as jnp
import numpy as np
from jax.experimental import pallas as pl
from jax.experimental.pallas import tpu as pltpu

LANE = 128
SUBLANE = 8


def _mape_kernel(p_ref, l_ref, sum_out_ref, cnt_out_ref, sum_acc, cnt_acc, *,
                 tile_rows, blocks_per_split, num_blocks, rows_in_last,
                 mask_last_block, gate_oob_steps):
    s = pl.program_id(0)  # split index ("parallel" axis)
    k = pl.program_id(1)  # reduction step within the split ("arbitrary" axis)

    @pl.when(k == 0)
    def _():
        sum_acc[...] = jnp.zeros_like(sum_acc)
        cnt_acc[...] = jnp.zeros_like(cnt_acc)

    # Global row-block index covered by this step.  The index_map clamps it to
    # num_blocks-1, so out-of-range duplicate steps reload the last block and
    # are skipped entirely by the scalar gate below.
    blk = s * blocks_per_split + k

    def accumulate(p, l, mask):
        # Single select per element; the dead-branch inf/nan from |l| == 0 (or
        # OOB garbage rows, which are masked) never propagates through where().
        dist = jnp.where(mask, jnp.abs(p - l) / jnp.abs(l), 0.0)
        # Vreg-shaped accumulation: only cheap VPU adds per step; the
        # cross-lane/sublane reduce is deferred to the wrapper.
        sum_acc[...] = sum_acc[...] + dist.reshape(-1, SUBLANE, LANE).sum(axis=0)
        # Count is exact per lane-slot up to 2^24 contributions (~1.7e10 total
        # valid elements).
        cnt_acc[...] = cnt_acc[...] + mask.astype(jnp.float32).reshape(
            -1, SUBLANE, LANE).sum(axis=0)

    def body():
        p = p_ref[...].astype(jnp.float32)
        l = l_ref[...].astype(jnp.float32)
        base_mask = l != 0.0

        if not mask_last_block:
            # All blocks are fully valid rows: no row mask anywhere.
            accumulate(p, l, base_mask)
        elif num_blocks == 1:
            # Single (partial) block: always apply the row mask.
            row_idx = jax.lax.broadcasted_iota(jnp.int32, (tile_rows, LANE), 0)
            accumulate(p, l, jnp.logical_and(base_mask, row_idx < rows_in_last))
        else:
            # Only the final block pays for the iota/row mask; interior blocks
            # run the lean path.  (OOB rows of the edge block may hold garbage
            # labels that would pass the l != 0 test, so the mask is required.)
            is_last = blk == num_blocks - 1

            @pl.when(jnp.logical_not(is_last))
            def _():
                accumulate(p, l, base_mask)

            @pl.when(is_last)
            def _():
                row_idx = jax.lax.broadcasted_iota(jnp.int32,
                                                   (tile_rows, LANE), 0)
                accumulate(p, l,
                           jnp.logical_and(base_mask, row_idx < rows_in_last))

    if gate_oob_steps:
        @pl.when(blk < num_blocks)
        def _():
            body()
    else:
        body()

    # Lane-dense per-split partials, written once at the end of the split.
    @pl.when(k == pl.num_programs(1) - 1)
    def _():
        sum_out_ref[...] = sum_acc[...].reshape(1, SUBLANE, LANE)
        cnt_out_ref[...] = cnt_acc[...].reshape(1, SUBLANE, LANE)


def _round_up(x, m):
    return ((x + m - 1) // m) * m


def _row_multiple(dtype):
    # Sublane packing: one vreg holds 8 rows of f32, 16 of bf16, 32 of int8.
    itemsize = jnp.dtype(dtype).itemsize
    return SUBLANE * max(1, 4 // max(1, min(itemsize, 4)))


@functools.lru_cache(maxsize=None)
def _default_tile_rows():
    # Best-effort chip query: v7x's 3.2 TB/s HBM makes the ~0.35us per-step
    # overhead a larger fraction, so use bigger tiles there; v5e/v6e already
    # sit on the roofline plateau at 2048 rows (1 MiB/input/step).
    try:
        version = str(getattr(pltpu.get_tpu_info(), "chip_version", "")).lower()
        if "7" in version:
            return 4096
    except Exception:
        pass
    return 2048


@functools.partial(jax.jit,
                   static_argnames=("tile_rows", "num_splits", "core_parallel"))
def _mape_loss_impl(preds, labels, tile_rows, num_splits, core_parallel):
    assert preds.shape == labels.shape
    n = int(np.prod(preds.shape))

    p_flat = preds.reshape(-1)
    l_flat = labels.reshape(-1)

    rows = n // LANE
    tail = n - rows * LANE

    total_sum = jnp.float32(0.0)
    total_cnt = jnp.float32(0.0)

    if tail:
        # < 128-element tail: a handful of jnp ops, combined with the kernel's
        # partials below.  Avoids padding (and copying) the full arrays.
        pt = p_flat[rows * LANE:].astype(jnp.float32)
        lt = l_flat[rows * LANE:].astype(jnp.float32)
        tmask = lt != 0.0
        total_sum = jnp.sum(jnp.where(tmask, jnp.abs(pt - lt) / jnp.abs(lt), 0.0))
        total_cnt = jnp.sum(tmask.astype(jnp.float32))

    if rows:
        if tail:
            # TODO(synk): contiguous-prefix slice still costs one copy for
            # ragged n; a fully copy-free path needs an ANY-space manual-DMA
            # kernel.
            p2 = p_flat[: rows * LANE].reshape(rows, LANE)
            l2 = l_flat[: rows * LANE].reshape(rows, LANE)
        else:
            # n % 128 == 0: pure bitcast reshape, no copy.
            p2 = p_flat.reshape(rows, LANE)
            l2 = l_flat.reshape(rows, LANE)

        row_mult = max(_row_multiple(preds.dtype), _row_multiple(labels.dtype))
        tile = min(int(tile_rows), _round_up(rows, row_mult))
        tile = max(_round_up(tile, row_mult), row_mult)

        num_blocks = pl.cdiv(rows, tile)
        nsplits = max(1, min(int(num_splits), num_blocks))
        blocks_per_split = pl.cdiv(num_blocks, nsplits)

        mask_last_block = (rows % tile) != 0
        rows_in_last = rows - (num_blocks - 1) * tile
        gate_oob_steps = (nsplits * blocks_per_split) != num_blocks

        kernel = functools.partial(
            _mape_kernel,
            tile_rows=tile,
            blocks_per_split=blocks_per_split,
            num_blocks=num_blocks,
            rows_in_last=rows_in_last,
            mask_last_block=mask_last_block,
            gate_oob_steps=gate_oob_steps,
        )

        def in_map(s, k):
            # Clamp so edge splits never request a fully out-of-bounds block;
            # the kernel's scalar gate skips those duplicate steps.
            return (jnp.minimum(s * blocks_per_split + k, num_blocks - 1), 0)

        def out_map(s, k):
            return (s, 0, 0)

        # VMEM estimate: 2 inputs x 2 pipeline buffers in the input dtype plus
        # ~5 full-tile f32 element-wise temporaries (upcast p, upcast l, mask,
        # dist, reduce staging) live during the body.
        itemsize = max(jnp.dtype(preds.dtype).itemsize,
                       jnp.dtype(labels.dtype).itemsize)
        est = 2 * 2 * tile * LANE * itemsize + 5 * tile * LANE * 4

        if core_parallel and nsplits > 1:
            # Opt-in for v7x: shard the split axis across the 2 TensorCores.
            semantics = (pltpu.CORE_PARALLEL, pltpu.ARBITRARY)
        else:
            semantics = ("parallel", "arbitrary")
        cp_kwargs = dict(dimension_semantics=semantics)
        if est > (12 << 20):
            cp_kwargs["vmem_limit_bytes"] = int(min(est + (8 << 20), 64 << 20))

        sums, cnts = pl.pallas_call(
            kernel,
            out_shape=(
                jax.ShapeDtypeStruct((nsplits, SUBLANE, LANE), jnp.float32),
                jax.ShapeDtypeStruct((nsplits, SUBLANE, LANE), jnp.float32),
            ),
            grid_spec=pltpu.PrefetchScalarGridSpec(
                num_scalar_prefetch=0,
                grid=(nsplits, blocks_per_split),
                in_specs=[
                    pl.BlockSpec((tile, LANE), in_map),
                    pl.BlockSpec((tile, LANE), in_map),
                ],
                out_specs=[
                    pl.BlockSpec((1, SUBLANE, LANE), out_map),
                    pl.BlockSpec((1, SUBLANE, LANE), out_map),
                ],
                scratch_shapes=[
                    pltpu.VMEM((SUBLANE, LANE), jnp.float32),  # sum partials
                    pltpu.VMEM((SUBLANE, LANE), jnp.float32),  # count partials
                ],
            ),
            compiler_params=pltpu.CompilerParams(**cp_kwargs),
        )(p2, l2)

        total_sum = total_sum + jnp.sum(sums)
        total_cnt = total_cnt + jnp.sum(cnts)

    # NOTE: if every label is zero (or the input is empty), total_cnt == 0 and
    # this returns nan, matching torch.mean(distance[mask]) over an empty
    # selection.
    return total_sum / total_cnt


def mape_loss(preds, labels, *, tile_rows=None, num_splits=1,
              core_parallel=False):
    """MAPE loss: mean(|p - l| / |l|) over elements where l != 0.

    bf16 (or other 16-bit) inputs are accepted as-is and upcast inside the
    kernel -- this halves HBM traffic for a purely bandwidth-bound reduction.
    On v7x, pass num_splits=2 (and optionally core_parallel=True) to split the
    reduction across both TensorCores.
    """
    if tile_rows is None:
        tile_rows = _default_tile_rows()
    return _mape_loss_impl(preds, labels, int(tile_rows), int(num_splits),
                           bool(core_parallel))


def _reference(preds, labels):
    preds = np.asarray(preds, np.float32)
    labels = np.asarray(labels, np.float32)
    mask = labels != 0
    dist = np.abs(preds - labels)[mask] / np.abs(labels)[mask]
    return dist.mean()


if __name__ == "__main__":
    key = jax.random.PRNGKey(0)

    def make_inputs(k, shape, zero_frac=0.2):
        k1, k2, k3 = jax.random.split(k, 3)
        preds = jax.random.normal(k1, shape, dtype=jnp.float32)
        labels = jax.random.normal(k2, shape, dtype=jnp.float32)
        drop = jax.random.uniform(k3, shape) < zero_frac
        labels = jnp.where(drop, 0.0, labels)
        return preds, labels

    k0, k1, k2, k3 = jax.random.split(key, 4)

    # 1) Primary example: NCHW [2, 4, 16, 16] (n = 2048 -> single block).
    preds, labels = make_inputs(k0, (2, 4, 16, 16))
    loss = jax.block_until_ready(mape_loss(preds, labels))
    ref = _reference(np.array(preds), np.array(labels))
    np.testing.assert_allclose(np.array(loss), ref, rtol=1e-5, atol=1e-6)

    # 2) Multi-tile / multi-split path: small tile that does not divide the
    #    row count (exercises last-block row masking) and a split count that
    #    produces clamped duplicate steps (exercises the scalar pl.when gate).
    preds2, labels2 = make_inputs(k1, (4, 4, 32, 32))
    loss2 = jax.block_until_ready(
        mape_loss(preds2, labels2, tile_rows=24, num_splits=4))
    ref2 = _reference(np.array(preds2), np.array(labels2))
    np.testing.assert_allclose(np.array(loss2), ref2, rtol=1e-5, atol=1e-6)

    # 3) Ragged case (n % 128 != 0): aligned prefix in the kernel, tail in jnp.
    preds3, labels3 = make_inputs(k2, (2, 3, 7, 5))
    loss3 = jax.block_until_ready(mape_loss(preds3, labels3))
    ref3 = _reference(np.array(preds3), np.array(labels3))
    np.testing.assert_allclose(np.array(loss3), ref3, rtol=1e-5, atol=1e-6)

    # 4) bf16 inputs accepted natively (halves HBM traffic; upcast in-kernel).
    preds4, labels4 = make_inputs(k3, (2, 4, 16, 16))
    preds4_bf = preds4.astype(jnp.bfloat16)
    labels4_bf = labels4.astype(jnp.bfloat16)
    loss4 = jax.block_until_ready(mape_loss(preds4_bf, labels4_bf))
    ref4 = _reference(np.array(preds4_bf.astype(jnp.float32)),
                      np.array(labels4_bf.astype(jnp.float32)))
    np.testing.assert_allclose(np.array(loss4), ref4, rtol=1e-5, atol=1e-6)

    print("KERNEL_OK")
</pallas_src>

<mosaic_0001>
module attributes {stable_mosaic.version = 11 : i64} {
  func.func @_mape_kernel(%arg0: i32, %arg1: i32, %arg2: memref<16x128xf32, #tpu.memory_space<vmem>>, %arg3: memref<16x128xf32, #tpu.memory_space<vmem>>, %arg4: memref<1x8x128xf32, #tpu.memory_space<vmem>>, %arg5: memref<1x8x128xf32, #tpu.memory_space<vmem>>, %arg6: memref<8x128xf32, #tpu.memory_space<vmem>>, %arg7: memref<8x128xf32, #tpu.memory_space<vmem>>) attributes {dimension_semantics = [#tpu.dimension_semantics<parallel>, #tpu.dimension_semantics<arbitrary>], iteration_bounds = array<i64: 1, 1>, scalar_prefetch = 0 : i64, scratch_operands = 2 : i64, tpu.core_type = #tpu.core_type<tc>, window_params = [{transform_indices = @transform_0, window_bounds = array<i64: 16, 128>}, {transform_indices = @transform_1, window_bounds = array<i64: 16, 128>}, {transform_indices = @transform_2, window_bounds = array<i64: 1, 8, 128>}, {transform_indices = @transform_3, window_bounds = array<i64: 1, 8, 128>}]} {
    %c0_i32 = arith.constant 0 : i32
    %0 = arith.cmpi eq, %arg1, %c0_i32 : i32
    %1 = arith.extui %0 : i1 to i32
    %c0_i32_0 = arith.constant 0 : i32
    %2 = arith.cmpi ne, %1, %c0_i32_0 : i32
    scf.if %2 {
      %cst_17 = arith.constant 0.000000e+00 : f32
      %28 = vector.broadcast %cst_17 : f32 to vector<8x128xf32>
      %c0_18 = arith.constant 0 : index
      %c0_19 = arith.constant 0 : index
      %29 = vector.load %arg6[%c0_18, %c0_19] : memref<8x128xf32, #tpu.memory_space<vmem>>, vector<8x128xf32>
      tpu.vector_store %arg6[%c0_18, %c0_19], %28 {strides = array<i32>} : memref<8x128xf32, #tpu.memory_space<vmem>>, vector<8x128xf32>,
      %cst_20 = arith.constant 0.000000e+00 : f32
      %30 = vector.broadcast %cst_20 : f32 to vector<8x128xf32>
      %c0_21 = arith.constant 0 : index
      %c0_22 = arith.constant 0 : index
      %31 = vector.load %arg7[%c0_21, %c0_22] : memref<8x128xf32, #tpu.memory_space<vmem>>, vector<8x128xf32>
      tpu.vector_store %arg7[%c0_21, %c0_22], %30 {strides = array<i32>} : memref<8x128xf32, #tpu.memory_space<vmem>>, vector<8x128xf32>,
    } else {
    }
    %c0 = arith.constant 0 : index
    %c0_1 = arith.constant 0 : index
    %3 = vector.load %arg2[%c0, %c0_1] : memref<16x128xf32, #tpu.memory_space<vmem>>, vector<16x128xf32>
    %c0_2 = arith.constant 0 : index
    %c0_3 = arith.constant 0 : index
    %4 = vector.load %arg3[%c0_2, %c0_3] : memref<16x128xf32, #tpu.memory_space<vmem>>, vector<16x128xf32>
    %cst = arith.constant 0.000000e+00 : f32
    %5 = vector.broadcast %cst : f32 to vector<16x128xf32>
    %6 = arith.cmpf one, %4, %5 : vector<16x128xf32>
    %7 = arith.subf %3, %4 : vector<16x128xf32>
    %8 = math.absf %7 : vector<16x128xf32>
    %9 = math.absf %4 : vector<16x128xf32>
    %10 = arith.divf %8, %9 : vector<16x128xf32>
    %cst_4 = arith.constant 0.000000e+00 : f32
    %11 = vector.broadcast %cst_4 : f32 to vector<16x128xf32>
    %12 = arith.select %6, %10, %11 : vector<16x128xi1>, vector<16x128xf32>
    %c0_5 = arith.constant 0 : index
    %c0_6 = arith.constant 0 : index
    %13 = vector.load %arg6[%c0_5, %c0_6] : memref<8x128xf32, #tpu.memory_space<vmem>>, vector<8x128xf32>
    %14 = vector.shape_cast %12 : vector<16x128xf32> to vector<2x8x128xf32>
    %cst_7 = arith.constant dense<0.000000e+00> : vector<8x128xf32>
    %15 = vector.multi_reduction <add>, %14, %cst_7 [0] : vector<2x8x128xf32> to vector<8x128xf32>
    %16 = arith.addf %13, %15 : vector<8x128xf32>
    %c0_8 = arith.constant 0 : index
    %c0_9 = arith.constant 0 : index
    %17 = vector.load %arg6[%c0_8, %c0_9] : memref<8x128xf32, #tpu.memory_space<vmem>>, vector<8x128xf32>
    tpu.vector_store %arg6[%c0_8, %c0_9], %16 {strides = array<i32>} : memref<8x128xf32, #tpu.memory_space<vmem>>, vector<8x128xf32>,
    %c0_10 = arith.constant 0 : index
    %c0_11 = arith.constant 0 : index
    %18 = vector.load %arg7[%c0_10, %c0_11] : memref<8x128xf32, #tpu.memory_space<vmem>>, vector<8x128xf32>
    %19 = arith.extui %6 : vector<16x128xi1> to vector<16x128xi32>
    %20 = arith.sitofp %19 : vector<16x128xi32> to vector<16x128xf32>
    %21 = vector.shape_cast %20 : vector<16x128xf32> to vector<2x8x128xf32>
    %cst_12 = arith.constant dense<0.000000e+00> : vector<8x128xf32>
    %22 = vector.multi_reduction <add>, %21, %cst_12 [0] : vector<2x8x128xf32> to vector<8x128xf32>
    %23 = arith.addf %18, %22 : vector<8x128xf32>
    %c0_13 = arith.constant 0 : index
    %c0_14 = arith.constant 0 : index
    %24 = vector.load %arg7[%c0_13, %c0_14] : memref<8x128xf32, #tpu.memory_space<vmem>>, vector<8x128xf32>
    tpu.vector_store %arg7[%c0_13, %c0_14], %23 {strides = array<i32>} : memref<8x128xf32, #tpu.memory_space<vmem>>, vector<8x128xf32>,
    %c0_i32_15 = arith.constant 0 : i32
    %25 = arith.cmpi eq, %arg1, %c0_i32_15 : i32
    %26 = arith.extui %25 : i1 to i32
    %c0_i32_16 = arith.constant 0 : i32
    %27 = arith.cmpi ne, %26, %c0_i32_16 : i32
    scf.if %27 {
      %c0_17 = arith.constant 0 : index
      %c0_18 = arith.constant 0 : index
      %28 = vector.load %arg6[%c0_17, %c0_18] : memref<8x128xf32, #tpu.memory_space<vmem>>, vector<8x128xf32>
      %29 = vector.shape_cast %28 : vector<8x128xf32> to vector<1x8x128xf32>
      %c0_19 = arith.constant 0 : index
      %c0_20 = arith.constant 0 : index
      %c0_21 = arith.constant 0 : index
      %30 = vector.load %arg4[%c0_19, %c0_20, %c0_21] : memref<1x8x128xf32, #tpu.memory_space<vmem>>, vector<1x8x128xf32>
      tpu.vector_store %arg4[%c0_19, %c0_20, %c0_21], %29 {strides = array<i32>} : memref<1x8x128xf32, #tpu.memory_space<vmem>>, vector<1x8x128xf32>,
      %c0_22 = arith.constant 0 : index
      %c0_23 = arith.constant 0 : index
      %31 = vector.load %arg7[%c0_22, %c0_23] : memref<8x128xf32, #tpu.memory_space<vmem>>, vector<8x128xf32>
      %32 = vector.shape_cast %31 : vector<8x128xf32> to vector<1x8x128xf32>
      %c0_24 = arith.constant 0 : index
      %c0_25 = arith.constant 0 : index
      %c0_26 = arith.constant 0 : index
      %33 = vector.load %arg5[%c0_24, %c0_25, %c0_26] : memref<1x8x128xf32, #tpu.memory_space<vmem>>, vector<1x8x128xf32>
      tpu.vector_store %arg5[%c0_24, %c0_25, %c0_26], %32 {strides = array<i32>} : memref<1x8x128xf32, #tpu.memory_space<vmem>>, vector<1x8x128xf32>,
    } else {
    }
    return
  }
  func.func @transform_0(%arg0: i32, %arg1: i32) -> (i32, i32) {
    %c1_i32 = arith.constant 1 : i32
    %0 = arith.muli %arg0, %c1_i32 : i32
    %1 = arith.addi %0, %arg1 : i32
    %c0_i32 = arith.constant 0 : i32
    %2 = arith.minsi %1, %c0_i32 : i32
    %c0_i32_0 = arith.constant 0 : i32
    %c0_i32_1 = arith.constant 0 : i32
    return %2, %c0_i32_0 : i32, i32
  }
  func.func @transform_1(%arg0: i32, %arg1: i32) -> (i32, i32) {
    %c1_i32 = arith.constant 1 : i32
    %0 = arith.muli %arg0, %c1_i32 : i32
    %1 = arith.addi %0, %arg1 : i32
    %c0_i32 = arith.constant 0 : i32
    %2 = arith.minsi %1, %c0_i32 : i32
    %c0_i32_0 = arith.constant 0 : i32
    %c0_i32_1 = arith.constant 0 : i32
    return %2, %c0_i32_0 : i32, i32
  }
  func.func @transform_2(%arg0: i32, %arg1: i32) -> (i32, i32, i32) {
    %c0_i32 = arith.constant 0 : i32
    %c0_i32_0 = arith.constant 0 : i32
    %c0_i32_1 = arith.constant 0 : i32
    return %arg0, %c0_i32, %c0_i32_0 : i32, i32, i32
  }
  func.func @transform_3(%arg0: i32, %arg1: i32) -> (i32, i32, i32) {
    %c0_i32 = arith.constant 0 : i32
    %c0_i32_0 = arith.constant 0 : i32
    %c0_i32_1 = arith.constant 0 : i32
    return %arg0, %c0_i32, %c0_i32_0 : i32, i32, i32
  }
}

</mosaic_0001>

<bundles_post_ra>
// kernel: _mape_loss_impl.1
= control target key start
LH: loop header
LB: loop body
LE: loop exit
PB: predicated region body
PF: predicated region fallthrough
CT: control target
= control target key end

     0   :  { %v173_v4 = vmov 0.0   ;;  %s216_s1 = inlined_call_operand.vmem [shape: f32[16,128], index: 1, kind: input, shape index: {}]   ;;  %s217_s0 = inlined_call_operand.vmem [shape: f32[16,128], index: 0, kind: input, shape index: {}]   ;;  %s218_s3 = inlined_call_operand.vmem [shape: f32[1,8,128], index: 3, kind: output, shape index: {1}]   ;;  %s219_s2 = inlined_call_operand.vmem [shape: f32[1,8,128], index: 2, kind: output, shape index: {0}]  }
   0x1   :  { %v85_v0 = vld [vmem:[%s216_s1] sm:$0xff]  ;;  %v86_v1 = vld [vmem:[%s216_s1 + $0x8] sm:$0xff] }
   0x2   :  { %vm87_vm0 = vcmp.ne.f32.partialorder %v85_v0, 0.0  ;;  %v93_v2 = vand.u32 2147483647, %v85_v0  ;;  %vm88_vm1 = vcmp.ne.f32.partialorder %v86_v1, 0.0  ;;  %v94_v3 = vand.u32 2147483647, %v86_v1 }
   0x3   :  { %v166_v5 = vsel %vm87_vm0, 1.0, %v173_v4  ;;  %v167_v6 = vsel %vm88_vm1, 1.0, %v173_v4  ;;  %v83_v8 = vld [vmem:[%s217_s0] sm:$0xff]  ;;  %v84_v11 = vld [vmem:[%s217_s0 + $0x8] sm:$0xff] }
   0x4   :  { %169 = vrcp.f32 %v93_v2  ;;  %v136_v7 = vadd.f32 %v167_v6, %v166_v5  ;;  %v89_v13 = vsub.f32 %v83_v8, %v85_v0  ;;  %v106_v14 = vand.u32 2147483648, %v93_v2 }
   0x5   :  { %171 = vrcp.f32 %v94_v3  ;;  %vm100_vm2 = vweird.f32 %v93_v2  ;;  %v121_v17 = vand.u32 2147483648, %v94_v3  ;;  %v90_v18 = vsub.f32 %v84_v11, %v86_v1 }
   0x6   :  { %145 = vst [vmem:[%s218_s3] sm:$0xff] %v136_v7  ;;  %vm115_vm4 = vweird.f32 %v94_v3  ;;  %v107_v21 = vor.u32 1.1754944e-38, %v106_v14  ;;  %v91_v23 = vand.u32 2147483647, %v89_v13  ;;  %vm105_vm7 = vcmp.eq.f32.partialorder %v93_v2, 8.507059e+37 }
   0x7   :  { %v122_v25 = vor.u32 1.1754944e-38, %v121_v17  ;;  %v92_v26 = vand.u32 2147483647, %v90_v18  ;;  %vm120_vm9 = vcmp.eq.f32.partialorder %v94_v3, 8.507059e+37 }
   0xa   :  { %v170_v9 = vpop.eup %169 }
   0xb   :  { %v172_v10 = vpop.eup %171  ;;  %v96_v12 = vmul.f32 %v170_v9, %v93_v2  ;;  %vm101_vm3 = vweird.f32 %v170_v9 }
   0xc   :  { %v111_v15 = vmul.f32 %v172_v10, %v94_v3  ;;  %vm116_vm5 = vweird.f32 %v172_v10  ;;  %vm102_vm6 = vmor %vm100_vm2, %vm101_vm3 }
   0xd   :  { %v97_v16 = vsub.f32 1.0, %v96_v12  ;;  %vm117_vm8 = vmor %vm115_vm4, %vm116_vm5 }
   0xe   :  { %v112_v19 = vsub.f32 1.0, %v111_v15 }
   0xf   :  { %v98_v20 = vmul.f32 %v170_v9, %v97_v16 }
  0x10   :  { %v113_v22 = vmul.f32 %v172_v10, %v112_v19 }
  0x11   :  { %v99_v24 = vadd.f32 %v170_v9, %v98_v20 }
  0x12   :  { %v114_v27 = vadd.f32 %v172_v10, %v113_v22 }
  0x13   :  { %v103_v28 = vsel %vm102_vm6, %v170_v9, %v99_v24 }
  0x14   :  { %v108_v29 = vsel %vm105_vm7, %v107_v21, %v103_v28  ;;  %v118_v30 = vsel %vm117_vm8, %v172_v10, %v114_v27 }
  0x15   :  { %v109_v31 = vmul.f32 %v108_v29, %v91_v23  ;;  %v123_v32 = vsel %vm120_vm9, %v122_v25, %v118_v30 }
  0x16   :  { %v124_v33 = vmul.f32 %v123_v32, %v92_v26 }
  0x17   :  { %v125_v34 = vsel %vm87_vm0, %v109_v31, 0.0 }
  0x18   :  { %v126_v35 = vsel %vm88_vm1, %v124_v33, 0.0 }
  0x19   :  { %v128_v36 = vadd.f32 %v126_v35, %v125_v34 }
  0x1b   :  { %143 = vst [vmem:[%s219_s2] sm:$0xff] %v128_v36 }

</bundles_post_ra>
